<compile_context>
chip_gen: v7x
topology: tpu7x:2x2x1
jax: 0.10.0
libtpu: 0.0.40
codegen_flags: <defaults>
</compile_context>

<pallas_src>
import functools

import jax
import jax.numpy as jnp
import numpy as np
from jax.experimental import pallas as pl
from jax.experimental.pallas import tpu as pltpu


def _round_up(x, m):
    return (x + m - 1) // m * m


# --------------------------------------------------------------------------- #
# Kernel bodies
# --------------------------------------------------------------------------- #
def _make_resident_kernel(add_identity: bool, has_id: bool):
    """Weights fully VMEM-resident; grid = (row_tiles,)."""

    def kernel(*refs):
        if has_id:
            x_ref, w1_ref, b1_ref, w2_ref, b2_ref, id_ref, o_ref = refs
        else:
            x_ref, w1_ref, b1_ref, w2_ref, b2_ref, o_ref = refs
            id_ref = x_ref  # fused residual: reuse the already-resident x tile

        h = jnp.dot(x_ref[...], w1_ref[...], preferred_element_type=jnp.float32)
        h = jnp.maximum(h + b1_ref[...], 0.0)
        out = jnp.dot(h.astype(w2_ref.dtype), w2_ref[...],
                      preferred_element_type=jnp.float32)
        out = out + b2_ref[...]
        if add_identity:
            out = out + id_ref[...].astype(jnp.float32)
        o_ref[...] = out.astype(o_ref.dtype)

    return kernel


def _make_streaming_kernel(add_identity: bool, has_id: bool):
    """Weights streamed in H-chunks; grid = (row_tiles, h_tiles), reduction last,
    partial sums into an f32 VMEM accumulator (init/finalize via pl.when)."""

    def kernel(*refs):
        if has_id:
            x_ref, w1_ref, b1_ref, w2_ref, b2_ref, id_ref, o_ref, acc_ref = refs
        else:
            x_ref, w1_ref, b1_ref, w2_ref, b2_ref, o_ref, acc_ref = refs
            id_ref = x_ref

        h_idx = pl.program_id(1)

        @pl.when(h_idx == 0)
        def _init():
            base = jnp.broadcast_to(b2_ref[...].astype(jnp.float32), acc_ref.shape)
            if add_identity:
                base = base + id_ref[...].astype(jnp.float32)
            acc_ref[...] = base

        h = jnp.dot(x_ref[...], w1_ref[...], preferred_element_type=jnp.float32)
        h = jnp.maximum(h + b1_ref[...], 0.0)
        acc_ref[...] += jnp.dot(h.astype(w2_ref.dtype), w2_ref[...],
                                preferred_element_type=jnp.float32)

        @pl.when(h_idx == pl.num_programs(1) - 1)
        def _finalize():
            o_ref[...] = acc_ref[...].astype(o_ref.dtype)

    return kernel


# --------------------------------------------------------------------------- #
# Per-generation configuration
# --------------------------------------------------------------------------- #
def _device_config():
    kind = ""
    try:
        kind = jax.devices()[0].device_kind.lower()
    except Exception:
        pass
    if "v7" in kind:
        # 64 MiB physical VMEM per TensorCore: never request all of it.
        return dict(vmem_limit=48 << 20, resident_budget=38 << 20,
                    tm_resident=256, tm_stream=512)
    if "v6" in kind:
        return dict(vmem_limit=96 << 20, resident_budget=80 << 20,
                    tm_resident=256, tm_stream=1024)
    if "v5" in kind:
        return dict(vmem_limit=96 << 20, resident_budget=80 << 20,
                    tm_resident=256, tm_stream=256)
    # Unknown chip / interpreter: conservative.
    return dict(vmem_limit=64 << 20, resident_budget=40 << 20,
                tm_resident=256, tm_stream=256)


# --------------------------------------------------------------------------- #
# One-time weight preparation (hoisted out of the per-call path)
# --------------------------------------------------------------------------- #
def prepare_ffn_params(w1, b1, w2, b2, *, compute_dtype=jnp.bfloat16, th=512):
    """Cast weights to the MXU compute dtype and pad feature dims lane-dense
    (multiples of 128); the hidden dim is additionally padded to a multiple of the
    reduction tile `th` so no tile-shrink loop is ever needed.  Call once, reuse."""
    D, H = w1.shape
    H2, Do = w2.shape
    assert H2 == H and b1.shape == (H,) and b2.shape == (Do,)

    th = max(128, _round_up(int(th), 128))
    D_p = _round_up(D, 128)
    Do_p = _round_up(Do, 128)
    H_128 = _round_up(H, 128)
    th = min(th, H_128)
    H_p = _round_up(H_128, th)          # zero-padded hidden cols/rows are inert

    cd = jnp.dtype(compute_dtype)
    w1p = jnp.pad(w1.astype(cd), ((0, D_p - D), (0, H_p - H)))
    b1p = jnp.pad(b1.astype(jnp.float32), (0, H_p - H)).reshape(1, H_p)
    w2p = jnp.pad(w2.astype(cd), ((0, H_p - H), (0, Do_p - Do)))
    b2p = jnp.pad(b2.astype(jnp.float32), (0, Do_p - Do)).reshape(1, Do_p)
    return dict(w1=w1p, b1=b1p, w2=w2p, b2=b2p,
                dims=(D, H, Do), th=th, compute_dtype=cd)


# --------------------------------------------------------------------------- #
# Forward
# --------------------------------------------------------------------------- #
@functools.partial(jax.jit, static_argnames=(
    "dims", "th", "compute_dtype", "add_identity",
    "vmem_limit", "resident_budget", "tm_resident", "tm_stream"))
def _ffn_call(x, w1p, b1p, w2p, b2p, identity, *, dims, th, compute_dtype,
              add_identity, vmem_limit, resident_budget, tm_resident, tm_stream):
    D, H, Do = dims
    orig_shape = x.shape
    M = int(np.prod(orig_shape[:-1]))
    D_p, H_p = w1p.shape
    Do_p = w2p.shape[1]
    out_dtype = x.dtype
    cd = compute_dtype
    cd_sz = jnp.dtype(cd).itemsize
    out_sz = jnp.dtype(out_dtype).itemsize

    has_id = add_identity and (identity is not None)
    fuse_id = add_identity and (identity is None)
    if fuse_id and Do != D:
        raise ValueError(
            "identity=None with add_identity=True requires output_dim == embed_dim")
    id_sz = jnp.dtype(identity.dtype).itemsize if has_id else 0

    # ---- mode + tile selection (all static) -------------------------------
    M8 = _round_up(max(M, 1), 8)
    tm_res = _round_up(min(tm_resident, M8), 8)

    def resident_footprint(tm):
        w = 2 * (w1p.size + w2p.size) * cd_sz          # weights (double-buffered)
        b = 2 * (b1p.size + b2p.size) * 4
        xs = 2 * tm * D_p * cd_sz
        os = 2 * tm * Do_p * out_sz
        ids = 2 * tm * Do_p * id_sz
        hh = tm * H_p * (4 + cd_sz)                    # f32 activation + cast temp
        return w + b + xs + os + ids + hh

    th_eff = min(th, H_p)
    if H_p % th_eff != 0:                               # defensive (shouldn't happen)
        th_eff = H_p
    n_h = H_p // th_eff

    resident = (resident_footprint(tm_res) <= resident_budget) or (n_h <= 1)

    if resident:
        tm_eff = tm_res
    else:
        tm_eff = _round_up(min(tm_stream, M8), 8)

        def streaming_footprint(tm):
            xs = 2 * tm * D_p * cd_sz
            w1c = 2 * D_p * th_eff * cd_sz
            w2c = 2 * th_eff * Do_p * cd_sz
            bs = 2 * (th_eff + Do_p) * 4
            acc = tm * Do_p * 4
            os = 2 * tm * Do_p * out_sz
            ids = 2 * tm * Do_p * id_sz
            hh = tm * th_eff * (4 + cd_sz)
            return xs + w1c + w2c + bs + acc + os + ids + hh

        while tm_eff > 64 and streaming_footprint(tm_eff) > int(0.85 * vmem_limit):
            tm_eff = max(64, tm_eff // 2)

    M_p = _round_up(max(M, 1), tm_eff)

    # ---- per-call operand prep (only x / identity) -------------------------
    x2 = jnp.pad(x.reshape(M, D).astype(cd), ((0, M_p - M), (0, D_p - D)))
    operands = [x2, w1p, b1p, w2p, b2p]
    if has_id:
        idp = jnp.pad(identity.reshape(M, Do), ((0, M_p - M), (0, Do_p - Do)))
        operands.append(idp)

    # ---- specs --------------------------------------------------------------
    if resident:
        grid = (M_p // tm_eff,)
        in_specs = [
            pl.BlockSpec((tm_eff, D_p), lambda i: (i, 0)),     # x row tile
            pl.BlockSpec((D_p, H_p), lambda i: (0, 0)),        # W1 (constant -> 1 DMA)
            pl.BlockSpec((1, H_p), lambda i: (0, 0)),          # b1 (constant)
            pl.BlockSpec((H_p, Do_p), lambda i: (0, 0)),       # W2 (constant)
            pl.BlockSpec((1, Do_p), lambda i: (0, 0)),         # b2 (constant)
        ]
        if has_id:
            in_specs.append(pl.BlockSpec((tm_eff, Do_p), lambda i: (i, 0)))
        out_specs = pl.BlockSpec((tm_eff, Do_p), lambda i: (i, 0))
        scratch = []
        kernel = _make_resident_kernel(add_identity, has_id)
        dim_sem = ("parallel",)
        weight_reads = 1
    else:
        grid = (M_p // tm_eff, n_h)
        in_specs = [
            pl.BlockSpec((tm_eff, D_p), lambda i, h: (i, 0)),  # x row tile
            pl.BlockSpec((D_p, th_eff), lambda i, h: (0, h)),  # W1 column chunk
            pl.BlockSpec((1, th_eff), lambda i, h: (0, h)),    # b1 chunk
            pl.BlockSpec((th_eff, Do_p), lambda i, h: (h, 0)), # W2 row chunk
            pl.BlockSpec((1, Do_p), lambda i, h: (0, 0)),      # b2
        ]
        if has_id:
            in_specs.append(pl.BlockSpec((tm_eff, Do_p), lambda i, h: (i, 0)))
        out_specs = pl.BlockSpec((tm_eff, Do_p), lambda i, h: (i, 0))
        scratch = [pltpu.VMEM((tm_eff, Do_p), jnp.float32)]
        kernel = _make_streaming_kernel(add_identity, has_id)
        dim_sem = ("parallel", "arbitrary")
        weight_reads = M_p // tm_eff

    bytes_accessed = int(
        M_p * D_p * cd_sz
        + weight_reads * (w1p.size + w2p.size) * cd_sz
        + (b1p.size + b2p.size) * 4
        + M_p * Do_p * out_sz
        + (M_p * Do_p * id_sz if has_id else 0))
    cost = pl.CostEstimate(
        flops=2 * M_p * (D_p * H_p + H_p * Do_p),
        transcendentals=0,
        bytes_accessed=bytes_accessed)

    out2 = pl.pallas_call(
        kernel,
        out_shape=jax.ShapeDtypeStruct((M_p, Do_p), out_dtype),
        grid_spec=pltpu.PrefetchScalarGridSpec(
            num_scalar_prefetch=0,
            grid=grid,
            in_specs=in_specs,
            out_specs=out_specs,
            scratch_shapes=scratch),
        compiler_params=pltpu.CompilerParams(
            dimension_semantics=dim_sem,
            vmem_limit_bytes=vmem_limit),
        cost_estimate=cost,
    )(*operands)

    return out2[:M, :Do].reshape(*orig_shape[:-1], Do)


def ffn_apply(params, x, identity=None, *, add_identity=True, _force_streaming=False):
    """Forward pass using pre-padded weights from prepare_ffn_params()."""
    cfg = _device_config()
    resident_budget = 0 if _force_streaming else cfg["resident_budget"]
    return _ffn_call(
        x, params["w1"], params["b1"], params["w2"], params["b2"], identity,
        dims=params["dims"], th=params["th"], compute_dtype=params["compute_dtype"],
        add_identity=add_identity,
        vmem_limit=cfg["vmem_limit"], resident_budget=resident_budget,
        tm_resident=cfg["tm_resident"], tm_stream=cfg["tm_stream"])


def ffn_forward(x, w1, b1, w2, b2, identity=None, *, add_identity=True,
                compute_dtype=jnp.bfloat16):
    """One-shot convenience wrapper (prepares weights every call — prefer
    prepare_ffn_params + ffn_apply for repeated use)."""
    params = prepare_ffn_params(w1, b1, w2, b2, compute_dtype=compute_dtype)
    return ffn_apply(params, x, identity, add_identity=add_identity)


# --------------------------------------------------------------------------- #
# Reference (float64 numpy, precision-mode independent) and self-test
# --------------------------------------------------------------------------- #
def _ref_ffn_np(x, w1, b1, w2, b2, identity=None, add_identity=True):
    x64 = np.asarray(x, dtype=np.float64)
    h = np.maximum(x64 @ np.asarray(w1, np.float64) + np.asarray(b1, np.float64), 0.0)
    out = h @ np.asarray(w2, np.float64) + np.asarray(b2, np.float64)
    if not add_identity:
        return out
    idn = x64 if identity is None else np.asarray(identity, np.float64)
    return idn + out


if __name__ == "__main__":
    key = jax.random.PRNGKey(0)

    def init_ffn(k, D, H, Do):
        kw1, kb1, kw2, kb2 = jax.random.split(k, 4)
        lim1, lim2 = 1.0 / np.sqrt(D), 1.0 / np.sqrt(H)
        w1 = jax.random.uniform(kw1, (D, H), minval=-lim1, maxval=lim1, dtype=jnp.float32)
        b1 = jax.random.uniform(kb1, (H,), minval=-lim1, maxval=lim1, dtype=jnp.float32)
        w2 = jax.random.uniform(kw2, (H, Do), minval=-lim2, maxval=lim2, dtype=jnp.float32)
        b2 = jax.random.uniform(kb2, (Do,), minval=-lim2, maxval=lim2, dtype=jnp.float32)
        return w1, b1, w2, b2

    # Case 1: module defaults at small shape (batch=2, seq=8, embed=32, ff=128).
    B, S, D, H = 2, 8, 32, 128
    k1, k2, kx, kid = jax.random.split(key, 4)
    w1, b1, w2, b2 = init_ffn(k1, D, H, D)
    x = jax.random.normal(kx, (B, S, D), dtype=jnp.float32)
    ref = _ref_ffn_np(x, w1, b1, w2, b2)

    # Weight prep hoisted out of the per-call path (done once, reused below).
    params_f32 = prepare_ffn_params(w1, b1, w2, b2, compute_dtype=jnp.float32)
    params_bf16 = prepare_ffn_params(w1, b1, w2, b2, compute_dtype=jnp.bfloat16)

    out_f32 = jax.block_until_ready(ffn_apply(params_f32, x))
    np.testing.assert_allclose(np.asarray(out_f32), ref, rtol=5e-3, atol=5e-3)

    out_bf16 = jax.block_until_ready(ffn_apply(params_bf16, x))
    np.testing.assert_allclose(np.asarray(out_bf16), ref, rtol=3e-2, atol=3e-2)

    # Explicit identity tensor path (identity streamed in its own dtype).
    identity = jax.random.normal(kid, (B, S, D), dtype=jnp.float32)
    out_id = jax.block_until_ready(ffn_apply(params_f32, x, identity))
    ref_id = _ref_ffn_np(x, w1, b1, w2, b2, identity=identity)
    np.testing.assert_allclose(np.asarray(out_id), ref_id, rtol=5e-3, atol=5e-3)

    # Case 2: awkward, non-aligned dims (row/feature/hidden padding), no identity.
    B2, S2, D2, H2, Do2 = 2, 33, 160, 384, 96
    k3, kx2 = jax.random.split(k2)
    w1b, b1b, w2b, b2b = init_ffn(k3, D2, H2, Do2)
    x2 = jax.random.normal(kx2, (B2, S2, D2), dtype=jnp.float32)
    ref_b = _ref_ffn_np(x2, w1b, b1b, w2b, b2b, add_identity=False)

    params_b = prepare_ffn_params(w1b, b1b, w2b, b2b, compute_dtype=jnp.float32)
    out_b = jax.block_until_ready(ffn_apply(params_b, x2, add_identity=False))
    np.testing.assert_allclose(np.asarray(out_b), ref_b, rtol=5e-3, atol=5e-3)

    # Case 3: force the streaming (H-chunked, f32-accumulator) fallback path.
    params_s = prepare_ffn_params(w1b, b1b, w2b, b2b, compute_dtype=jnp.float32, th=128)
    out_s = jax.block_until_ready(
        ffn_apply(params_s, x2, add_identity=False, _force_streaming=True))
    np.testing.assert_allclose(np.asarray(out_s), ref_b, rtol=5e-3, atol=5e-3)

    print("KERNEL_OK")
</pallas_src>

<mosaic_0001>
module attributes {stable_mosaic.version = 11 : i64} {
  func.func @kernel(%arg0: i32, %arg1: memref<16x128xf32, #tpu.memory_space<vmem>>, %arg2: memref<128x128xf32, #tpu.memory_space<vmem>>, %arg3: memref<1x128xf32, #tpu.memory_space<vmem>>, %arg4: memref<128x128xf32, #tpu.memory_space<vmem>>, %arg5: memref<1x128xf32, #tpu.memory_space<vmem>>, %arg6: memref<16x128xf32, #tpu.memory_space<vmem>>) attributes {dimension_semantics = [#tpu.dimension_semantics<parallel>], iteration_bounds = array<i64: 1>, scalar_prefetch = 0 : i64, scratch_operands = 0 : i64, tpu.core_type = #tpu.core_type<tc>, window_params = [{transform_indices = @transform_0, window_bounds = array<i64: 16, 128>}, {pipeline_mode = #tpu.pipeline_mode<synchronous>, transform_indices = @transform_1, window_bounds = array<i64: 128, 128>}, {pipeline_mode = #tpu.pipeline_mode<synchronous>, transform_indices = @transform_2, window_bounds = array<i64: 1, 128>}, {pipeline_mode = #tpu.pipeline_mode<synchronous>, transform_indices = @transform_3, window_bounds = array<i64: 128, 128>}, {pipeline_mode = #tpu.pipeline_mode<synchronous>, transform_indices = @transform_4, window_bounds = array<i64: 1, 128>}, {transform_indices = @transform_5, window_bounds = array<i64: 16, 128>}]} {
    %c0 = arith.constant 0 : index
    %c0_0 = arith.constant 0 : index
    %0 = vector.load %arg1[%c0, %c0_0] : memref<16x128xf32, #tpu.memory_space<vmem>>, vector<16x128xf32>
    %c0_1 = arith.constant 0 : index
    %c0_2 = arith.constant 0 : index
    %1 = vector.load %arg2[%c0_1, %c0_2] : memref<128x128xf32, #tpu.memory_space<vmem>>, vector<128x128xf32>
    %cst = arith.constant dense<0.000000e+00> : vector<16x128xf32>
    %2 = tpu.matmul %0, %1, %cst {dimension_numbers = #tpu.dot_dimension_numbers<[1], [0], [0], [1], [0, 0, 1, 1], [], []>} : vector<16x128xf32>, vector<128x128xf32>, vector<16x128xf32> -> vector<16x128xf32>
    %c0_3 = arith.constant 0 : index
    %c0_4 = arith.constant 0 : index
    %3 = vector.load %arg3[%c0_3, %c0_4] : memref<1x128xf32, #tpu.memory_space<vmem>>, vector<1x128xf32>
    %4 = vector.broadcast %3 : vector<1x128xf32> to vector<16x128xf32>
    %5 = arith.addf %2, %4 : vector<16x128xf32>
    %cst_5 = arith.constant 0.000000e+00 : f32
    %6 = vector.broadcast %cst_5 : f32 to vector<16x128xf32>
    %7 = arith.maximumf %5, %6 : vector<16x128xf32>
    %c0_6 = arith.constant 0 : index
    %c0_7 = arith.constant 0 : index
    %8 = vector.load %arg4[%c0_6, %c0_7] : memref<128x128xf32, #tpu.memory_space<vmem>>, vector<128x128xf32>
    %cst_8 = arith.constant dense<0.000000e+00> : vector<16x128xf32>
    %9 = tpu.matmul %7, %8, %cst_8 {dimension_numbers = #tpu.dot_dimension_numbers<[1], [0], [0], [1], [0, 0, 1, 1], [], []>} : vector<16x128xf32>, vector<128x128xf32>, vector<16x128xf32> -> vector<16x128xf32>
    %c0_9 = arith.constant 0 : index
    %c0_10 = arith.constant 0 : index
    %10 = vector.load %arg5[%c0_9, %c0_10] : memref<1x128xf32, #tpu.memory_space<vmem>>, vector<1x128xf32>
    %11 = vector.broadcast %10 : vector<1x128xf32> to vector<16x128xf32>
    %12 = arith.addf %9, %11 : vector<16x128xf32>
    %c0_11 = arith.constant 0 : index
    %c0_12 = arith.constant 0 : index
    %13 = vector.load %arg1[%c0_11, %c0_12] : memref<16x128xf32, #tpu.memory_space<vmem>>, vector<16x128xf32>
    %14 = arith.addf %12, %13 : vector<16x128xf32>
    %c0_13 = arith.constant 0 : index
    %c0_14 = arith.constant 0 : index
    %15 = vector.load %arg6[%c0_13, %c0_14] : memref<16x128xf32, #tpu.memory_space<vmem>>, vector<16x128xf32>
    tpu.vector_store %arg6[%c0_13, %c0_14], %14 {strides = array<i32>} : memref<16x128xf32, #tpu.memory_space<vmem>>, vector<16x128xf32>,
    return
  }
  func.func @transform_0(%arg0: i32) -> (i32, i32) {
    %c0_i32 = arith.constant 0 : i32
    %c0_i32_0 = arith.constant 0 : i32
    return %arg0, %c0_i32 : i32, i32
  }
  func.func @transform_1(%arg0: i32) -> (i32, i32) {
    %c0_i32 = arith.constant 0 : i32
    %c0_i32_0 = arith.constant 0 : i32
    %c0_i32_1 = arith.constant 0 : i32
    return %c0_i32, %c0_i32_0 : i32, i32
  }
  func.func @transform_2(%arg0: i32) -> (i32, i32) {
    %c0_i32 = arith.constant 0 : i32
    %c0_i32_0 = arith.constant 0 : i32
    %c0_i32_1 = arith.constant 0 : i32
    return %c0_i32, %c0_i32_0 : i32, i32
  }
  func.func @transform_3(%arg0: i32) -> (i32, i32) {
    %c0_i32 = arith.constant 0 : i32
    %c0_i32_0 = arith.constant 0 : i32
    %c0_i32_1 = arith.constant 0 : i32
    return %c0_i32, %c0_i32_0 : i32, i32
  }
  func.func @transform_4(%arg0: i32) -> (i32, i32) {
    %c0_i32 = arith.constant 0 : i32
    %c0_i32_0 = arith.constant 0 : i32
    %c0_i32_1 = arith.constant 0 : i32
    return %c0_i32, %c0_i32_0 : i32, i32
  }
  func.func @transform_5(%arg0: i32) -> (i32, i32) {
    %c0_i32 = arith.constant 0 : i32
    %c0_i32_0 = arith.constant 0 : i32
    return %arg0, %c0_i32 : i32, i32
  }
}

</mosaic_0001>

<bundles_post_ra>
// kernel: _ffn_call.1
= control target key start
LH: loop header
LB: loop body
LE: loop exit
PB: predicated region body
PF: predicated region fallthrough
CT: control target
= control target key end

     0   :  { %10 = vsyncpa [#allocation3], 0  ;;  %s761_s0 = inlined_call_operand.hbm [shape: f32[16,128], index: 0, kind: input, shape index: {}]   ;;  %s762_s1 = inlined_call_operand.hbm [shape: f32[128,128], index: 1, kind: input, shape index: {}]   ;;  %s763_s2 = inlined_call_operand.hbm [shape: f32[1,128], index: 2, kind: input, shape index: {}]   ;;  %s764_s3 = inlined_call_operand.hbm [shape: f32[128,128], index: 3, kind: input, shape index: {}]   ;;  %s765_s4 = inlined_call_operand.hbm [shape: f32[1,128], index: 4, kind: input, shape index: {}]   ;;  %s766_s5 = inlined_call_operand.hbm [shape: f32[16,128], index: 5, kind: output, shape index: {}]  }
   0x1   :  { %11 = vsyncpa [#allocation6], 0 }
   0x2   :  { %12 = vsyncpa [#allocation9], 0 }
   0x3   :  { %13 = vsyncpa [#allocation4], 0  ;;  %s628_s18 = smov [#allocation5]   ;;  %s629_s20 = smov [#allocation8]  }
   0x4   :  { %s31_s19 = sshll.u32 %s628_s18, 4  ;;  %s53_s21 = sshll.u32 %s629_s20, 4  ;;  %s32_s19 = int_to_ptr.vmem [resolvable:$true] %s31_s19  ;;  %s666_s21 = int_to_ptr.vmem [resolvable:$true] %s53_s21 }
   0x5   :  { %s488_s24 = scalar_lea.hbm %s762_s1, 2048 }
   0x6   :  { %p489_p0 = scmp.ne.s32.totalorder %s762_s1, %s488_s24  ;;  %p492_p1 = scmp.lt.u32.totalorder %s488_s24, %s762_s1 }
   0x8   :  { %p494_p2 = pnand %p492_p1, %p489_p0 }
   0xa   :  { %497 = shalt.err (!%p494_p2)
}
   0xb   :  { %s498_s29 = scalar_lea.vmem %s32_s19, 2048  ;;  %p503_p4 = scmp.lt.s32.totalorder %s32_s19, %s32_s19 }
   0xc   :  { %p499_p3 = scmp.ne.s32.totalorder %s32_s19, %s498_s29  ;;  %p504_p5 = scmp.lt.s32.totalorder %s498_s29, %s498_s29 }
   0xe   :  { %p505_p6 = por %p504_p5, %p503_p4 }
  0x10   :  { %p506_p7 = pnand %p505_p6, %p499_p3 }
  0x12   :  { %509 = shalt.err (!%p506_p7)
}
  0x13   :  { %s630_s30 = smov 128   ;;  %s631_s6 = smov 8  }
  0x14   :  { %37 = dma.hbm_to_vmem [thread:$0]  %s762_s1, 2048, %s32_s19, [#allocation6], %s630_s30, %s630_s30, %s631_s6  }
  0x15   :  { %s510_s11 = scalar_lea.hbm %s764_s3, 2048 }
  0x16   :  { %p511_p8 = scmp.ne.s32.totalorder %s764_s3, %s510_s11  ;;  %p514_p9 = scmp.lt.u32.totalorder %s510_s11, %s764_s3 }
  0x18   :  { %p516_p10 = pnand %p514_p9, %p511_p8 }
  0x1a   :  { %519 = shalt.err (!%p516_p10)
}
  0x1b   :  { %s520_s16 = scalar_lea.vmem %s666_s21, 2048  ;;  %p525_p12 = scmp.lt.s32.totalorder %s666_s21, %s666_s21 }
  0x1c   :  { %p521_p11 = scmp.ne.s32.totalorder %s666_s21, %s520_s16  ;;  %p526_p13 = scmp.lt.s32.totalorder %s520_s16, %s520_s16 }
  0x1e   :  { %p527_p0 = por %p526_p13, %p525_p12 }
  0x20   :  { %p528_p1 = pnand %p527_p0, %p521_p11 }
  0x22   :  { %531 = shalt.err (!%p528_p1)
}
  0x23   :  { %59 = dma.hbm_to_vmem [thread:$0]  %s764_s3, 2048, %s666_s21, [#allocation9], %s630_s30, %s630_s30, %s631_s6  }
  0x24   :  { %s632_s18 = smov [#allocation2]   ;;  %s633_s20 = smov [#allocation7]  }
  0x25   :  { %s19_s19 = sshll.u32 %s632_s18, 4  ;;  %s44_s22 = sshll.u32 %s633_s20, 4  ;;  %s20_s19 = int_to_ptr.vmem [resolvable:$true] %s19_s19  ;;  %s45_s22 = int_to_ptr.vmem [resolvable:$true] %s44_s22 }
  0x26   :  { %s532_s25 = scalar_lea.hbm %s761_s0, 256 }
  0x27   :  { %p533_p2 = scmp.ne.s32.totalorder %s761_s0, %s532_s25  ;;  %p536_p3 = scmp.lt.u32.totalorder %s532_s25, %s761_s0 }
  0x29   :  { %p538_p4 = pnand %p536_p3, %p533_p2 }
  0x2b   :  { %541 = shalt.err (!%p538_p4)
}
  0x2c   :  { %s542_s3 = scalar_lea.vmem %s20_s19, 256  ;;  %p547_p6 = scmp.lt.s32.totalorder %s20_s19, %s20_s19 }
  0x2d   :  { %p543_p5 = scmp.ne.s32.totalorder %s20_s19, %s542_s3  ;;  %p548_p7 = scmp.lt.s32.totalorder %s542_s3, %s542_s3 }
  0x2f   :  { %p549_p8 = por %p548_p7, %p547_p6 }
  0x31   :  { %p550_p9 = pnand %p549_p8, %p543_p5 }
  0x33   :  { %553 = shalt.err (!%p550_p9)
}
  0x34   :  { %25 = dma.hbm_to_vmem [thread:$0]  %s761_s0, 256, %s20_s19, [#allocation3], %s630_s30, %s630_s30, %s631_s6  }
  0x35   :  { %s554_s10 = scalar_lea.hbm %s763_s2, 16 }
  0x36   :  { %p555_p10 = scmp.ne.s32.totalorder %s763_s2, %s554_s10  ;;  %p558_p11 = scmp.lt.u32.totalorder %s554_s10, %s763_s2 }
  0x38   :  { %p560_p12 = pnand %p558_p11, %p555_p10 }
  0x3a   :  { %563 = shalt.err (!%p560_p12)
}
  0x3b   :  { %s564_s15 = scalar_lea.vmem %s45_s22, 16  ;;  %s568_s16 = scalar_lea.vmem %s45_s22, 32 }
  0x3c   :  { %p565_p13 = scmp.ne.s32.totalorder %s45_s22, %s564_s15  ;;  %p569_p0 = scmp.lt.s32.totalorder %s45_s22, %s45_s22 }
  0x3d   :  { %p570_p1 = scmp.lt.s32.totalorder %s568_s16, %s564_s15 }
  0x3f   :  { %p571_p2 = por %p570_p1, %p569_p0 }
  0x41   :  { %p572_p3 = pnand %p571_p2, %p565_p13 }
  0x43   :  { %575 = shalt.err (!%p572_p3)
}
  0x44   :  { %47 = dma.hbm_to_vmem [thread:$0]  %s763_s2, 16, %s45_s22, [#allocation6]  }
  0x45   :  { %s634_s17 = smov [#allocation10]   ;;  %s576_s23 = scalar_lea.hbm %s765_s4, 16 }
  0x46   :  { %s66_s18 = sshll.u32 %s634_s17, 4  ;;  %p577_p4 = scmp.ne.s32.totalorder %s765_s4, %s576_s23  ;;  %s67_s18 = int_to_ptr.vmem [resolvable:$true] %s66_s18 }
  0x47   :  { %p580_p5 = scmp.lt.u32.totalorder %s576_s23, %s765_s4 }
  0x49   :  { %p582_p6 = pnand %p580_p5, %p577_p4 }
  0x4b   :  { %585 = shalt.err (!%p582_p6)
}
  0x4c   :  { %s586_s28 = scalar_lea.vmem %s67_s18, 16  ;;  %s590_s2 = scalar_lea.vmem %s67_s18, 32 }
  0x4d   :  { %p587_p7 = scmp.ne.s32.totalorder %s67_s18, %s586_s28  ;;  %p591_p8 = scmp.lt.s32.totalorder %s67_s18, %s67_s18 }
  0x4e   :  { %p592_p9 = scmp.lt.s32.totalorder %s590_s2, %s586_s28 }
  0x50   :  { %p593_p10 = por %p592_p9, %p591_p8 }
  0x52   :  { %p594_p11 = pnand %p593_p10, %p587_p7 }
  0x54   :  { %597 = shalt.err (!%p594_p11)
}
  0x55   :  { %69 = dma.hbm_to_vmem [thread:$0]  %s765_s4, 16, %s67_s18, [#allocation9]  }
  0x56   :  { %620 = dma.done.wait [#allocation3], 256  }
  0x57   :  { %621 = vsyncadd [#allocation3], 4294967040 }
  0x58   :  { %622 = dma.done.wait [#allocation6], 2064  }
  0x59   :  { %623 = vsyncadd [#allocation6], 4294965232 }
  0x5a   :  { %624 = dma.done.wait [#allocation9], 2064  }
  0x5b   :  { %625 = vsyncadd [#allocation9], 4294965232  ;;  %v87_v0 = vld [vmem:[#allocation5] sm:$0xff]  ;;  %v88_v1 = vld [vmem:[#allocation5 + $0x8] sm:$0xff]  ;;  %s635_s4 = smov [#allocation11]  }
  0x5c   :  { %v89_v2 = vld [vmem:[#allocation5 + $0x10] sm:$0xff]  ;;  %v416_v3 = vpack.c.bf16 %v88_v1, %v87_v0  ;;  %v90_v4 = vld [vmem:[#allocation5 + $0x18] sm:$0xff]  ;;  %v91_v6 = vld [vmem:[#allocation5 + $0x20] sm:$0xff]  ;;  %s294_s3 = sshll.u32 %s635_s4, 4  ;;  %s295_s3 = int_to_ptr.vmem [resolvable:$true] %s294_s3 }
  0x5d   :  { %v420_v5 = vpack.c.bf16 %v90_v4, %v89_v2  ;;  %v92_v7 = vld [vmem:[#allocation5 + $0x28] sm:$0xff]  ;;  %v93_v9 = vld [vmem:[#allocation5 + $0x30] sm:$0xff]  ;;  %v94_v10 = vld [vmem:[#allocation5 + $0x38] sm:$0xff]  ;;  %s598_s21 = scalar_lea.vmem %s295_s3, 256  ;;  %p603_p13 = scmp.lt.s32.totalorder %s295_s3, %s295_s3 }
  0x5e   :  { %417 = vmatprep.subr.bf16.mxu0 %v416_v3  ;;  %v424_v8 = vpack.c.bf16 %v92_v7, %v91_v6  ;;  %v742_v11 = vld [vmem:[#allocation2] sm:$0xff]  ;;  %v187_v12 = vld [vmem:[#allocation8] sm:$0xff]  ;;  %v190_v16 = vld [vmem:[#allocation8 + $0x18] sm:$0xff]  ;;  %v428_v20 = vpack.c.bf16 %v94_v10, %v93_v9  ;;  %p599_p12 = scmp.ne.s32.totalorder %s295_s3, %s598_s21  ;;  %p604_p0 = scmp.lt.s32.totalorder %s598_s21, %s598_s21 }
  0x5f   :  { %419 = vmatpush3.bf16.msra.mxu0 %v416_v3  ;;  %378 = vmatprep.mubr.f32.mxu0 %v742_v11  ;;  %v188_v13 = vld [vmem:[#allocation8 + $0x8] sm:$0xff]  ;;  %v189_v14 = vld [vmem:[#allocation8 + $0x10] sm:$0xff]  ;;  %v191_v18 = vld [vmem:[#allocation8 + $0x20] sm:$0xff] }
  0x60   :  { %421 = vmatprep.subr.bf16.mxu0 %v420_v5  ;;  %v448_v15 = vpack.c.bf16 %v188_v13, %v187_v12  ;;  %v452_v17 = vpack.c.bf16 %v190_v16, %v189_v14  ;;  %v192_v19 = vld [vmem:[#allocation8 + $0x28] sm:$0xff]  ;;  %v95_v21 = vld [vmem:[#allocation5 + $0x40] sm:$0xff]  ;;  %v193_v24 = vld [vmem:[#allocation8 + $0x30] sm:$0xff]  ;;  %p605_p1 = por %p604_p0, %p603_p13 }
  0x61   :  { %v96_v22 = vld [vmem:[#allocation5 + $0x48] sm:$0xff]  ;;  %v456_v23 = vpack.c.bf16 %v192_v19, %v191_v18  ;;  %v194_v25 = vld [vmem:[#allocation8 + $0x38] sm:$0xff]  ;;  %v97_v27 = vld [vmem:[#allocation5 + $0x50] sm:$0xff] }
  0x62   :  { %449 = vmatprep.subr.bf16.mxu1 %v448_v15  ;;  %v432_v26 = vpack.c.bf16 %v96_v22, %v95_v21  ;;  %v98_v28 = vld [vmem:[#allocation5 + $0x58] sm:$0xff]  ;;  %v460_v29 = vpack.c.bf16 %v194_v25, %v193_v24  ;;  %v195_v30 = vld [vmem:[#allocation8 + $0x40] sm:$0xff]  ;;  %v196_v31 = vld [vmem:[#allocation8 + $0x48] sm:$0xff]  ;;  %p606_p2 = pnand %p605_p1, %p599_p12 }
  0x63   :  { %423 = vmatpush3.bf16.msra.mxu0 %v420_v5  ;;  %451 = vmatpush3.bf16.msra.mxu1 %v448_v15  ;;  %v436_v32 = vpack.c.bf16 %v98_v28, %v97_v27  ;;  %v99_v33 = vld [vmem:[#allocation5 + $0x60] sm:$0xff]  ;;  %v100_v34 = vld [vmem:[#allocation5 + $0x68] sm:$0xff]  ;;  %v464_v35 = vpack.c.bf16 %v196_v31, %v195_v30  ;;  %v197_v36 = vld [vmem:[#allocation8 + $0x50] sm:$0xff] }
  0x64   :  { %425 = vmatprep.subr.bf16.mxu0 %v424_v8  ;;  %453 = vmatprep.subr.bf16.mxu1 %v452_v17  ;;  %v198_v37 = vld [vmem:[#allocation8 + $0x58] sm:$0xff]  ;;  %v440_v38 = vpack.c.bf16 %v100_v34, %v99_v33  ;;  %v101_v39 = vld [vmem:[#allocation5 + $0x70] sm:$0xff]  ;;  %v199_v42 = vld [vmem:[#allocation8 + $0x60] sm:$0xff] }
  0x65   :  { %v102_v40 = vld [vmem:[#allocation5 + $0x78] sm:$0xff]  ;;  %v468_v41 = vpack.c.bf16 %v198_v37, %v197_v36  ;;  %v200_v43 = vld [vmem:[#allocation8 + $0x68] sm:$0xff]  ;;  %v308_v50 = vld [vmem:[#allocation7] ss:$0 sm:$0xff] }
  0x66   :  { %v444_v44 = vpack.c.bf16 %v102_v40, %v101_v39  ;;  %v472_v45 = vpack.c.bf16 %v200_v43, %v199_v42  ;;  %v86_v46 = vld [vmem:[#allocation2 + $0x8] sm:$0xff]  ;;  %v309_v57 = vld [vmem:[#allocation10] ss:$0 sm:$0xff] }
  0x67   :  { %427 = vmatpush3.bf16.msra.mxu0 %v424_v8  ;;  %455 = vmatpush3.bf16.msra.mxu1 %v452_v17  ;;  %v201_v47 = vld [vmem:[#allocation8 + $0x70] sm:$0xff]  ;;  %v202_v48 = vld [vmem:[#allocation8 + $0x78] sm:$0xff] }
  0x68   :  { %429 = vmatprep.subr.bf16.mxu0 %v428_v20  ;;  %457 = vmatprep.subr.bf16.mxu1 %v456_v23  ;;  %v476_v49 = vpack.c.bf16 %v202_v48, %v201_v47 }
  0x6b   :  { %431 = vmatpush3.bf16.msra.mxu0 %v428_v20  ;;  %459 = vmatpush3.bf16.msra.mxu1 %v456_v23 }
  0x6c   :  { %433 = vmatprep.subr.bf16.mxu0 %v432_v26  ;;  %461 = vmatprep.subr.bf16.mxu1 %v460_v29 }
  0x6f   :  { %435 = vmatpush3.bf16.msra.mxu0 %v432_v26  ;;  %463 = vmatpush3.bf16.msra.mxu1 %v460_v29 }
  0x70   :  { %437 = vmatprep.subr.bf16.mxu0 %v436_v32  ;;  %465 = vmatprep.subr.bf16.mxu1 %v464_v35 }
  0x73   :  { %439 = vmatpush3.bf16.msra.mxu0 %v436_v32  ;;  %467 = vmatpush3.bf16.msra.mxu1 %v464_v35 }
  0x74   :  { %441 = vmatprep.subr.bf16.mxu0 %v440_v38  ;;  %469 = vmatprep.subr.bf16.mxu1 %v468_v41 }
  0x77   :  { %443 = vmatpush3.bf16.msra.mxu0 %v440_v38  ;;  %471 = vmatpush3.bf16.msra.mxu1 %v468_v41 }
  0x78   :  { %445 = vmatprep.subr.bf16.mxu0 %v444_v44  ;;  %473 = vmatprep.subr.bf16.mxu1 %v472_v45 }
  0x7b   :  { %447 = vmatpush3.bf16.msra.mxu0 %v444_v44  ;;  %475 = vmatpush3.bf16.msra.mxu1 %v472_v45 }
  0x7c   :  { %477 = vmatprep.subr.bf16.mxu1 %v476_v49 }
  0x7e   :  { %379 = vmatmul.mubr.f32.vlgmr.msra.gmra.mrb[0].mxu0 %v86_v46 }
  0x7f   :  { %479 = vmatpush3.bf16.msra.mxu1 %v476_v49 }
 0x151   :  { %v380_v51 = vpop.f32.mrb[0].mxu0 }
 0x152   :  { %v182_v52 = vadd.f32 %v380_v51, %v308_v50  ;;  %v176_v53 = vpop.f32.mrb[1].mxu0 }
 0x153   :  { %v177_v54 = vadd.f32 %v308_v50, %v176_v53 }
 0x154   :  { %v186_v56 = vmax.f32 %v182_v52, 0.0 }
 0x155   :  { %v185_v55 = vmax.f32 %v177_v54, 0.0 }
 0x157   :  { %413 = vmatprep.mubr.f32.mxu1 %v185_v55 }
 0x158   :  { %414 = vmatmul.mubr.f32.vlgmr.msra.gmra.mrb[0].mxu1 %v186_v56 }
 0x22b   :  { %v415_v58 = vpop.f32.mrb[0].mxu1 }
 0x22c   :  { %v282_v59 = vadd.f32 %v415_v58, %v309_v57  ;;  %v276_v60 = vpop.f32.mrb[1].mxu1 }
 0x22d   :  { %v277_v61 = vadd.f32 %v309_v57, %v276_v60 }
 0x22e   :  { %v286_v62 = vadd.f32 %v282_v59, %v86_v46 }
 0x22f   :  { %v285_v63 = vadd.f32 %v277_v61, %v742_v11 }
 0x230   :  { %288 = vst [vmem:[#allocation11 + $0x8] sm:$0xff] %v286_v62 }
 0x231   :  { %287 = vst [vmem:[#allocation11] sm:$0xff] %v285_v63 }
 0x232   :  { %609 = shalt.err (!%p606_p2)
}
 0x233   :  { %s610_s9 = scalar_lea.hbm %s766_s5, 256 }
 0x234   :  { %p611_p3 = scmp.ne.s32.totalorder %s766_s5, %s610_s9  ;;  %p614_p4 = scmp.lt.u32.totalorder %s610_s9, %s766_s5 }
 0x236   :  { %p616_p5 = pnand %p614_p4, %p611_p3 }
 0x238   :  { %619 = shalt.err (!%p616_p5)
}
 0x239   :  { %300 = dma.vmem_to_hbm [thread:$0]  %s295_s3, 256, %s766_s5, [#allocation4], %s630_s30, %s630_s30, %s631_s6  }
 0x23a   :  { %626 = dma.done.wait [#allocation4], 256  }
 0x23b   :  { %627 = vsyncadd [#allocation4], 4294967040 }
 0x23c   :  { %304 = vsyncpa [#allocation3], 1 }
 0x23d   :  { %305 = vsyncpa [#allocation6], 1 }
 0x23e   :  { %306 = vsyncpa [#allocation9], 1 }
 0x23f   :  { %307 = vsyncpa [#allocation4], 1 }

</bundles_post_ra>
